<compile_context>
chip_gen: v6e
topology: v6e:2x2x1
jax: 0.10.0
libtpu: 0.0.40
codegen_flags: <defaults>
</compile_context>

<pallas_src>
import math
import functools

import jax
import jax.numpy as jnp
from jax.experimental import pallas as pl
from jax.experimental.pallas import tpu as pltpu


def _gelu_exact(x):
    # Matches torch.nn.GELU() default (erf-based, not tanh approximation).
    return 0.5 * x * (1.0 + jax.lax.erf(x * (1.0 / math.sqrt(2.0))))


def mlp_kernel(x_ref, w1_ref, b1_ref, w2_ref, b2_ref, o_ref, acc_ref):
    """One (tile_m rows) x (tile_h hidden cols) step of x@W1+b1 -> GELU -> @W2 (+b2 at end)."""
    h_id = pl.program_id(1)
    n_h = pl.num_programs(1)

    @pl.when(h_id == 0)
    def _init():
        acc_ref[...] = jnp.zeros_like(acc_ref)

    x = x_ref[...]
    # First matmul in the operand dtype (f32 or bf16), accumulate in f32.
    h = jnp.dot(x, w1_ref[...], preferred_element_type=jnp.float32)
    h = h + b1_ref[...].astype(jnp.float32)          # bias + GELU in f32
    h = _gelu_exact(h)
    # Second matmul: cast activation to the weight dtype for the MXU,
    # accumulate in the f32 scratch.
    acc_ref[...] += jnp.dot(h.astype(w2_ref.dtype), w2_ref[...],
                            preferred_element_type=jnp.float32)

    @pl.when(h_id == n_h - 1)
    def _finalize():
        o_ref[...] = (acc_ref[...] + b2_ref[...].astype(jnp.float32)).astype(o_ref.dtype)


def perceiver_mlp(hidden_states, w1, b1, w2, b2, *,
                  tile_m=256, tile_h=2048, matmul_dtype=None):
    """hidden_states: [..., D]; w1: [D, H], b1: [H], w2: [H, D], b2: [D].

    matmul_dtype: if set (e.g. jnp.bfloat16), x/W1/W2 are cast to it for the
    MXU (f32 bias/GELU/accumulate kept) -- recommended on v6e/v7x.
    """
    orig_shape = hidden_states.shape
    D = orig_shape[-1]
    H = w1.shape[1]
    x2d = hidden_states.reshape(-1, D)
    M = x2d.shape[0]

    if matmul_dtype is not None:
        x2d = x2d.astype(matmul_dtype)
        w1 = w1.astype(matmul_dtype)
        w2 = w2.astype(matmul_dtype)
    out_dtype = x2d.dtype

    # ---- M (row) tiling: clamp tile to the row count so padding stays small.
    tm = max(8, min(int(tile_m), pl.cdiv(M, 8) * 8))
    tm -= tm % 8
    M_pad = pl.cdiv(M, tm) * tm
    if M_pad != M:
        # TODO(synk): ragged last tile via masked store would avoid this small pad.
        x2d = jnp.pad(x2d, ((0, M_pad - M), (0, 0)))

    # ---- H (hidden) tiling: only tile when H is large; otherwise keep
    # W1/W2 fully resident (fetched once).
    th = min(int(tile_h), H)
    if th != H and (H % th != 0 or th % 128 != 0):
        th = H
    n_h = H // th

    b1_2d = b1.reshape(1, H).astype(jnp.float32)
    b2_2d = b2.reshape(1, D).astype(jnp.float32)

    # Constant-index operands don't need double buffering.
    w_mode = pl.Buffered(buffer_count=1) if n_h == 1 else None
    const_mode = pl.Buffered(buffer_count=1)

    grid = (M_pad // tm, n_h)

    # ---- explicit VMEM budget: weights (+double buffer if H-tiled),
    # double-buffered x/out tiles, f32 accumulator, headroom.
    wbytes = jnp.dtype(w1.dtype).itemsize
    xbytes = jnp.dtype(x2d.dtype).itemsize
    n_wbuf = 1 if n_h == 1 else 2
    vmem_est = (n_wbuf * 2 * D * th * wbytes          # W1 + W2 tiles
                + (th + D) * 4                        # biases (f32)
                + 2 * tm * D * xbytes                 # x tiles (double buffered)
                + 2 * tm * D * xbytes                 # out tiles (double buffered)
                + tm * D * 4                          # accumulator
                + (4 << 20))                          # headroom
    vmem_limit = int(min(max(vmem_est, 16 << 20), 64 << 20))

    out2d = pl.pallas_call(
        mlp_kernel,
        out_shape=jax.ShapeDtypeStruct((M_pad, D), out_dtype),
        grid_spec=pltpu.PrefetchScalarGridSpec(
            num_scalar_prefetch=0,
            grid=grid,
            in_specs=[
                pl.BlockSpec((tm, D), lambda i, h: (i, 0)),                        # x rows
                pl.BlockSpec((D, th), lambda i, h: (0, h), pipeline_mode=w_mode),  # W1 tile
                pl.BlockSpec((1, th), lambda i, h: (0, h), pipeline_mode=w_mode),  # b1 tile
                pl.BlockSpec((th, D), lambda i, h: (h, 0), pipeline_mode=w_mode),  # W2 tile
                pl.BlockSpec((1, D), lambda i, h: (0, 0), pipeline_mode=const_mode),  # b2
            ],
            out_specs=pl.BlockSpec((tm, D), lambda i, h: (i, 0)),
            scratch_shapes=[pltpu.VMEM((tm, D), jnp.float32)],
        ),
        compiler_params=pltpu.CompilerParams(
            dimension_semantics=("parallel", "arbitrary"),
            vmem_limit_bytes=vmem_limit,
        ),
    )(x2d, w1, b1_2d, w2, b2_2d)

    return out2d[:M].reshape(orig_shape).astype(out_dtype)


def init_params(key, input_size, widening_factor, dtype=jnp.float32):
    """Deterministic init mimicking nn.Linear's uniform(-1/sqrt(fan_in), 1/sqrt(fan_in))."""
    hidden = widening_factor * input_size
    k1, k2, k3, k4 = jax.random.split(key, 4)
    bound1 = 1.0 / math.sqrt(input_size)
    bound2 = 1.0 / math.sqrt(hidden)
    w1 = jax.random.uniform(k1, (input_size, hidden), dtype, -bound1, bound1)
    b1 = jax.random.uniform(k2, (hidden,), dtype, -bound1, bound1)
    w2 = jax.random.uniform(k3, (hidden, input_size), dtype, -bound2, bound2)
    b2 = jax.random.uniform(k4, (input_size,), dtype, -bound2, bound2)
    return w1, b1, w2, b2


if __name__ == "__main__":
    input_size = 128
    widening_factor = 4
    batch, seq = 2, 8

    key = jax.random.PRNGKey(0)
    k_x, k_p = jax.random.split(key)
    x = jax.random.normal(k_x, (batch, seq, input_size), jnp.float32)
    w1, b1, w2, b2 = init_params(k_p, input_size, widening_factor)

    # Reference (same math as the PyTorch module, f32 throughout).
    ref = _gelu_exact(x @ w1 + b1) @ w2 + b2

    # 1) f32 path (v5e-friendly, exact torch numerics), weights fully resident.
    out = perceiver_mlp(x, w1, b1, w2, b2)
    out = jax.block_until_ready(out)
    assert out.shape == x.shape
    assert jnp.allclose(out, ref, atol=1e-4, rtol=1e-4), "f32 path mismatch"

    # 2) bf16 matmul operands, f32 bias/GELU/accumulate (v6e / v7x MXU path).
    out_bf16 = perceiver_mlp(x, w1, b1, w2, b2, matmul_dtype=jnp.bfloat16)
    out_bf16 = jax.block_until_ready(out_bf16)
    assert jnp.allclose(out_bf16.astype(jnp.float32), ref, atol=5e-2, rtol=5e-2), \
        "bf16 path mismatch"

    # 3) H-tiled accumulator path (what v7x needs at real Perceiver sizes).
    out_ht = perceiver_mlp(x, w1, b1, w2, b2, tile_h=128)
    out_ht = jax.block_until_ready(out_ht)
    assert jnp.allclose(out_ht, ref, atol=1e-4, rtol=1e-4), "H-tiled path mismatch"

    print("KERNEL_OK")
</pallas_src>

<mosaic_0001>
module attributes {stable_mosaic.version = 11 : i64} {
  func.func @mlp_kernel(%arg0: i32, %arg1: i32, %arg2: memref<16x128xf32, #tpu.memory_space<vmem>>, %arg3: memref<128x512xf32, #tpu.memory_space<vmem>>, %arg4: memref<1x512xf32, #tpu.memory_space<vmem>>, %arg5: memref<512x128xf32, #tpu.memory_space<vmem>>, %arg6: memref<1x128xf32, #tpu.memory_space<vmem>>, %arg7: memref<16x128xf32, #tpu.memory_space<vmem>>, %arg8: memref<16x128xf32, #tpu.memory_space<vmem>>) attributes {dimension_semantics = [#tpu.dimension_semantics<parallel>, #tpu.dimension_semantics<arbitrary>], iteration_bounds = array<i64: 1, 1>, scalar_prefetch = 0 : i64, scratch_operands = 1 : i64, tpu.core_type = #tpu.core_type<tc>, window_params = [{transform_indices = @transform_0, window_bounds = array<i64: 16, 128>}, {pipeline_mode = #tpu.pipeline_mode<synchronous>, transform_indices = @transform_1, window_bounds = array<i64: 128, 512>}, {pipeline_mode = #tpu.pipeline_mode<synchronous>, transform_indices = @transform_2, window_bounds = array<i64: 1, 512>}, {pipeline_mode = #tpu.pipeline_mode<synchronous>, transform_indices = @transform_3, window_bounds = array<i64: 512, 128>}, {pipeline_mode = #tpu.pipeline_mode<synchronous>, transform_indices = @transform_4, window_bounds = array<i64: 1, 128>}, {transform_indices = @transform_5, window_bounds = array<i64: 16, 128>}]} {
    %c0_i32 = arith.constant 0 : i32
    %0 = arith.cmpi eq, %arg1, %c0_i32 : i32
    %1 = arith.extui %0 : i1 to i32
    %c0_i32_0 = arith.constant 0 : i32
    %2 = arith.cmpi ne, %1, %c0_i32_0 : i32
    scf.if %2 {
      %cst_18 = arith.constant 0.000000e+00 : f32
      %25 = vector.broadcast %cst_18 : f32 to vector<16x128xf32>
      %c0_19 = arith.constant 0 : index
      %c0_20 = arith.constant 0 : index
      %26 = vector.load %arg8[%c0_19, %c0_20] : memref<16x128xf32, #tpu.memory_space<vmem>>, vector<16x128xf32>
      tpu.vector_store %arg8[%c0_19, %c0_20], %25 {strides = array<i32>} : memref<16x128xf32, #tpu.memory_space<vmem>>, vector<16x128xf32>,
    } else {
    }
    %c0 = arith.constant 0 : index
    %c0_1 = arith.constant 0 : index
    %3 = vector.load %arg2[%c0, %c0_1] : memref<16x128xf32, #tpu.memory_space<vmem>>, vector<16x128xf32>
    %c0_2 = arith.constant 0 : index
    %c0_3 = arith.constant 0 : index
    %4 = vector.load %arg3[%c0_2, %c0_3] : memref<128x512xf32, #tpu.memory_space<vmem>>, vector<128x512xf32>
    %cst = arith.constant dense<0.000000e+00> : vector<16x512xf32>
    %5 = tpu.matmul %3, %4, %cst {dimension_numbers = #tpu.dot_dimension_numbers<[1], [0], [0], [1], [0, 0, 1, 1], [], []>} : vector<16x128xf32>, vector<128x512xf32>, vector<16x512xf32> -> vector<16x512xf32>
    %c0_4 = arith.constant 0 : index
    %c0_5 = arith.constant 0 : index
    %6 = vector.load %arg4[%c0_4, %c0_5] : memref<1x512xf32, #tpu.memory_space<vmem>>, vector<1x512xf32>
    %7 = vector.broadcast %6 : vector<1x512xf32> to vector<16x512xf32>
    %8 = arith.addf %5, %7 : vector<16x512xf32>
    %cst_6 = arith.constant 5.000000e-01 : f32
    %9 = vector.broadcast %cst_6 : f32 to vector<16x512xf32>
    %10 = arith.mulf %9, %8 : vector<16x512xf32>
    %cst_7 = arith.constant 0.707106769 : f32
    %11 = vector.broadcast %cst_7 : f32 to vector<16x512xf32>
    %12 = arith.mulf %8, %11 : vector<16x512xf32>
    %13 = math.erf %12 : vector<16x512xf32>
    %cst_8 = arith.constant 1.000000e+00 : f32
    %14 = vector.broadcast %cst_8 : f32 to vector<16x512xf32>
    %15 = arith.addf %14, %13 : vector<16x512xf32>
    %16 = arith.mulf %10, %15 : vector<16x512xf32>
    %c0_9 = arith.constant 0 : index
    %c0_10 = arith.constant 0 : index
    %17 = vector.load %arg8[%c0_9, %c0_10] : memref<16x128xf32, #tpu.memory_space<vmem>>, vector<16x128xf32>
    %c0_11 = arith.constant 0 : index
    %c0_12 = arith.constant 0 : index
    %18 = vector.load %arg5[%c0_11, %c0_12] : memref<512x128xf32, #tpu.memory_space<vmem>>, vector<512x128xf32>
    %cst_13 = arith.constant dense<0.000000e+00> : vector<16x128xf32>
    %19 = tpu.matmul %16, %18, %cst_13 {dimension_numbers = #tpu.dot_dimension_numbers<[1], [0], [0], [1], [0, 0, 1, 1], [], []>} : vector<16x512xf32>, vector<512x128xf32>, vector<16x128xf32> -> vector<16x128xf32>
    %20 = arith.addf %17, %19 : vector<16x128xf32>
    %c0_14 = arith.constant 0 : index
    %c0_15 = arith.constant 0 : index
    %21 = vector.load %arg8[%c0_14, %c0_15] : memref<16x128xf32, #tpu.memory_space<vmem>>, vector<16x128xf32>
    tpu.vector_store %arg8[%c0_14, %c0_15], %20 {strides = array<i32>} : memref<16x128xf32, #tpu.memory_space<vmem>>, vector<16x128xf32>,
    %c0_i32_16 = arith.constant 0 : i32
    %22 = arith.cmpi eq, %arg1, %c0_i32_16 : i32
    %23 = arith.extui %22 : i1 to i32
    %c0_i32_17 = arith.constant 0 : i32
    %24 = arith.cmpi ne, %23, %c0_i32_17 : i32
    scf.if %24 {
      %c0_18 = arith.constant 0 : index
      %c0_19 = arith.constant 0 : index
      %25 = vector.load %arg8[%c0_18, %c0_19] : memref<16x128xf32, #tpu.memory_space<vmem>>, vector<16x128xf32>
      %c0_20 = arith.constant 0 : index
      %c0_21 = arith.constant 0 : index
      %26 = vector.load %arg6[%c0_20, %c0_21] : memref<1x128xf32, #tpu.memory_space<vmem>>, vector<1x128xf32>
      %27 = vector.broadcast %26 : vector<1x128xf32> to vector<16x128xf32>
      %28 = arith.addf %25, %27 : vector<16x128xf32>
      %c0_22 = arith.constant 0 : index
      %c0_23 = arith.constant 0 : index
      %29 = vector.load %arg7[%c0_22, %c0_23] : memref<16x128xf32, #tpu.memory_space<vmem>>, vector<16x128xf32>
      tpu.vector_store %arg7[%c0_22, %c0_23], %28 {strides = array<i32>} : memref<16x128xf32, #tpu.memory_space<vmem>>, vector<16x128xf32>,
    } else {
    }
    return
  }
  func.func @transform_0(%arg0: i32, %arg1: i32) -> (i32, i32) {
    %c0_i32 = arith.constant 0 : i32
    %c0_i32_0 = arith.constant 0 : i32
    return %arg0, %c0_i32 : i32, i32
  }
  func.func @transform_1(%arg0: i32, %arg1: i32) -> (i32, i32) {
    %c0_i32 = arith.constant 0 : i32
    %c0_i32_0 = arith.constant 0 : i32
    return %c0_i32, %arg1 : i32, i32
  }
  func.func @transform_2(%arg0: i32, %arg1: i32) -> (i32, i32) {
    %c0_i32 = arith.constant 0 : i32
    %c0_i32_0 = arith.constant 0 : i32
    return %c0_i32, %arg1 : i32, i32
  }
  func.func @transform_3(%arg0: i32, %arg1: i32) -> (i32, i32) {
    %c0_i32 = arith.constant 0 : i32
    %c0_i32_0 = arith.constant 0 : i32
    return %arg1, %c0_i32 : i32, i32
  }
  func.func @transform_4(%arg0: i32, %arg1: i32) -> (i32, i32) {
    %c0_i32 = arith.constant 0 : i32
    %c0_i32_0 = arith.constant 0 : i32
    %c0_i32_1 = arith.constant 0 : i32
    return %c0_i32, %c0_i32_0 : i32, i32
  }
  func.func @transform_5(%arg0: i32, %arg1: i32) -> (i32, i32) {
    %c0_i32 = arith.constant 0 : i32
    %c0_i32_0 = arith.constant 0 : i32
    return %arg0, %c0_i32 : i32, i32
  }
}

</mosaic_0001>

<bundles_post_ra>
// kernel: tpu_custom_call.1
= control target key start
LH: loop header
LB: loop body
LE: loop exit
PB: predicated region body
PF: predicated region fallthrough
CT: control target
= control target key end

     0   :  { %10 = vsyncpa [#allocation4], 0  ;;  %s899_s0 = inlined_call_operand.hbm [shape: f32[16,128], index: 0, kind: input, shape index: {}]   ;;  %s900_s1 = inlined_call_operand.hbm [shape: f32[128,512], index: 1, kind: input, shape index: {}]   ;;  %s901_s2 = inlined_call_operand.hbm [shape: f32[1,512], index: 2, kind: input, shape index: {}]   ;;  %s902_s3 = inlined_call_operand.hbm [shape: f32[512,128], index: 3, kind: input, shape index: {}]   ;;  %s903_s4 = inlined_call_operand.vmem [shape: f32[1,128], index: 4, kind: input, shape index: {}]   ;;  %s904_s5 = inlined_call_operand.hbm [shape: f32[16,128], index: 5, kind: output, shape index: {}]  }
   0x1   :  { %11 = vsyncpa [#allocation7], 0 }
   0x2   :  { %12 = vsyncpa [#allocation10], 0 }
   0x3   :  { %13 = vsyncpa [#allocation5], 0  ;;  %s828_s18 = smov [#allocation6]  }
   0x4   :  { %s31_s19 = sshll.u32 %s828_s18, 4  ;;  %s32_s19 = int_to_ptr.vmem [resolvable:$true] %s31_s19 }
   0x5   :  { %s728_s20 = scalar_lea.vmem %s32_s19, 8192  ;;  %p733_p1 = scmp.lt.s32.totalorder %s32_s19, %s32_s19 }
   0x6   :  { %p729_p0 = scmp.ne.s32.totalorder %s32_s19, %s728_s20  ;;  %p734_p2 = scmp.lt.s32.totalorder %s728_s20, %s728_s20 }
   0x8   :  { %p735_p3 = por %p734_p2, %p733_p1 }
   0xa   :  { %p736_p4 = pnand %p735_p3, %p729_p0 }
   0xc   :  { %739 = shalt.err (!%p736_p4)
}
   0xd   :  { %s829_s21 = smov 512   ;;  %s830_s22 = smov 32  }
   0xe   :  { %37 = dma.hbm_to_vmem [thread:$0]  %s900_s1, 8192, %s32_s19, [#allocation7], %s829_s21, %s829_s21, %s830_s22  }
   0xf   :  { %s831_s25 = smov [#allocation3]  }
  0x10   :  { %s19_s26 = sshll.u32 %s831_s25, 4  ;;  %s20_s26 = int_to_ptr.vmem [resolvable:$true] %s19_s26 }
  0x11   :  { %s748_s27 = scalar_lea.vmem %s20_s26, 256  ;;  %p753_p6 = scmp.lt.s32.totalorder %s20_s26, %s20_s26 }
  0x12   :  { %p749_p5 = scmp.ne.s32.totalorder %s20_s26, %s748_s27  ;;  %p754_p7 = scmp.lt.s32.totalorder %s748_s27, %s748_s27 }
  0x14   :  { %p755_p8 = por %p754_p7, %p753_p6 }
  0x16   :  { %p756_p9 = pnand %p755_p8, %p749_p5 }
  0x18   :  { %759 = shalt.err (!%p756_p9)
}
  0x19   :  { %s832_s28 = smov 128   ;;  %s833_s29 = smov 8  }
  0x1a   :  { %25 = dma.hbm_to_vmem [thread:$0]  %s899_s0, 256, %s20_s26, [#allocation4], %s832_s28, %s832_s28, %s833_s29  }
  0x1b   :  { %s834_s1 = smov [#allocation8]   ;;  %s835_s8 = smov [#allocation9]  }
  0x1c   :  { %s44_s7 = sshll.u32 %s834_s1, 4  ;;  %s53_s9 = sshll.u32 %s835_s8, 4  ;;  %s45_s7 = int_to_ptr.vmem [resolvable:$true] %s44_s7  ;;  %s54_s9 = int_to_ptr.vmem [resolvable:$true] %s53_s9 }
  0x1d   :  { %s768_s10 = scalar_lea.vmem %s45_s7, 64  ;;  %p773_p11 = scmp.lt.s32.totalorder %s45_s7, %s45_s7 }
  0x1e   :  { %p769_p10 = scmp.ne.s32.totalorder %s45_s7, %s768_s10  ;;  %p774_p12 = scmp.lt.s32.totalorder %s768_s10, %s768_s10 }
  0x20   :  { %p775_p13 = por %p774_p12, %p773_p11 }
  0x22   :  { %p776_p0 = pnand %p775_p13, %p769_p10 }
  0x24   :  { %779 = shalt.err (!%p776_p0)
}
  0x25   :  { %47 = dma.hbm_to_vmem [thread:$0]  %s901_s2, 64, %s45_s7, [#allocation7]  }
  0x26   :  { %s788_s13 = scalar_lea.vmem %s54_s9, 8192  ;;  %p793_p2 = scmp.lt.s32.totalorder %s54_s9, %s54_s9 }
  0x27   :  { %p789_p1 = scmp.ne.s32.totalorder %s54_s9, %s788_s13  ;;  %p794_p3 = scmp.lt.s32.totalorder %s788_s13, %s788_s13 }
  0x29   :  { %p795_p4 = por %p794_p3, %p793_p2 }
  0x2b   :  { %p796_p5 = pnand %p795_p4, %p789_p1 }
  0x2d   :  { %799 = shalt.err (!%p796_p5)
}
  0x2e   :  { %59 = dma.hbm_to_vmem [thread:$0]  %s902_s3, 8192, %s54_s9, [#allocation10], %s832_s28, %s832_s28, %s833_s29  }
  0x2f   :  { %820 = dma.done.wait [#allocation4], 256  }
  0x30   :  { %821 = vsyncadd [#allocation4], 4294967040 }
  0x31   :  { %822 = dma.done.wait [#allocation7], 8256  }
  0x32   :  { %823 = vsyncadd [#allocation7], 4294959040 }
  0x33   :  { %824 = dma.done.wait [#allocation10], 8192  }
  0x34   :  { %825 = vsyncadd [#allocation10], 4294959104  ;;  %v836_v0 = vmov 0.0   ;;  %v143_v1 = vld [vmem:[#allocation6 + $0x1e8] sm:$0xff]  ;;  %v145_v2 = vld [vmem:[#allocation6 + $0x1f8] sm:$0xff]  ;;  %s837_s15 = smov [#allocation11]  }
  0x35   :  { %232 = vmatprep.mubr.f32.mxu0 %v836_v0  ;;  %309 = vmatprep.mubr.f32.mxu1 %v836_v0  ;;  %v142_v3 = vld [vmem:[#allocation6 + $0x1e0] sm:$0xff]  ;;  %v144_v4 = vld [vmem:[#allocation6 + $0x1f0] sm:$0xff]  ;;  %v139_v5 = vld [vmem:[#allocation6 + $0x1c8] sm:$0xff]  ;;  %s603_s16 = sshll.u32 %s837_s15, 4  ;;  %s604_s16 = int_to_ptr.vmem [resolvable:$true] %s603_s16 }
  0x36   :  { %168 = vmatprep.subr.mxu0 %v143_v1  ;;  %245 = vmatprep.subr.mxu1 %v145_v2  ;;  %v141_v6 = vld [vmem:[#allocation6 + $0x1d8] sm:$0xff]  ;;  %v138_v7 = vld [vmem:[#allocation6 + $0x1c0] sm:$0xff]  ;;  %v140_v8 = vld [vmem:[#allocation6 + $0x1d0] sm:$0xff]  ;;  %s800_s17 = scalar_lea.vmem %s604_s16, 256  ;;  %p805_p7 = scmp.lt.s32.totalorder %s604_s16, %s604_s16 }
  0x37   :  { %169 = vmatpush1.msra.mxu0 %v142_v3  ;;  %246 = vmatpush1.msra.mxu1 %v144_v4  ;;  %v135_v9 = vld [vmem:[#allocation6 + $0x1a8] sm:$0xff]  ;;  %v137_v10 = vld [vmem:[#allocation6 + $0x1b8] sm:$0xff]  ;;  %v134_v11 = vld [vmem:[#allocation6 + $0x1a0] sm:$0xff]  ;;  %p801_p6 = scmp.ne.s32.totalorder %s604_s16, %s800_s17  ;;  %p806_p8 = scmp.lt.s32.totalorder %s800_s17, %s800_s17 }
  0x38   :  { %170 = vmatprep.subr.mxu0 %v139_v5  ;;  %247 = vmatprep.subr.mxu1 %v141_v6  ;;  %v136_v12 = vld [vmem:[#allocation6 + $0x1b0] sm:$0xff]  ;;  %v131_v13 = vld [vmem:[#allocation6 + $0x188] sm:$0xff]  ;;  %v133_v14 = vld [vmem:[#allocation6 + $0x198] sm:$0xff] }
  0x39   :  { %171 = vmatpush1.msra.mxu0 %v138_v7  ;;  %248 = vmatpush1.msra.mxu1 %v140_v8  ;;  %v130_v15 = vld [vmem:[#allocation6 + $0x180] sm:$0xff]  ;;  %v132_v16 = vld [vmem:[#allocation6 + $0x190] sm:$0xff]  ;;  %v127_v17 = vld [vmem:[#allocation6 + $0x168] sm:$0xff]  ;;  %p807_p9 = por %p806_p8, %p805_p7 }
  0x3a   :  { %172 = vmatprep.subr.mxu0 %v135_v9  ;;  %249 = vmatprep.subr.mxu1 %v137_v10  ;;  %v129_v18 = vld [vmem:[#allocation6 + $0x178] sm:$0xff]  ;;  %v126_v19 = vld [vmem:[#allocation6 + $0x160] sm:$0xff]  ;;  %v128_v20 = vld [vmem:[#allocation6 + $0x170] sm:$0xff] }
  0x3b   :  { %173 = vmatpush1.msra.mxu0 %v134_v11  ;;  %250 = vmatpush1.msra.mxu1 %v136_v12  ;;  %v123_v21 = vld [vmem:[#allocation6 + $0x148] sm:$0xff]  ;;  %v125_v22 = vld [vmem:[#allocation6 + $0x158] sm:$0xff]  ;;  %v122_v23 = vld [vmem:[#allocation6 + $0x140] sm:$0xff]  ;;  %p808_p10 = pnand %p807_p9, %p801_p6 }
  0x3c   :  { %174 = vmatprep.subr.mxu0 %v131_v13  ;;  %251 = vmatprep.subr.mxu1 %v133_v14  ;;  %v124_v24 = vld [vmem:[#allocation6 + $0x150] sm:$0xff]  ;;  %v119_v25 = vld [vmem:[#allocation6 + $0x128] sm:$0xff]  ;;  %v121_v26 = vld [vmem:[#allocation6 + $0x138] sm:$0xff] }
  0x3d   :  { %175 = vmatpush1.msra.mxu0 %v130_v15  ;;  %252 = vmatpush1.msra.mxu1 %v132_v16  ;;  %v118_v27 = vld [vmem:[#allocation6 + $0x120] sm:$0xff]  ;;  %v120_v28 = vld [vmem:[#allocation6 + $0x130] sm:$0xff]  ;;  %v115_v29 = vld [vmem:[#allocation6 + $0x108] sm:$0xff] }
  0x3e   :  { %176 = vmatprep.subr.mxu0 %v127_v17  ;;  %253 = vmatprep.subr.mxu1 %v129_v18  ;;  %v117_v30 = vld [vmem:[#allocation6 + $0x118] sm:$0xff]  ;;  %v114_v31 = vld [vmem:[#allocation6 + $0x100] sm:$0xff]  ;;  %v116_v32 = vld [vmem:[#allocation6 + $0x110] sm:$0xff] }
  0x3f   :  { %177 = vmatpush1.msra.mxu0 %v126_v19  ;;  %254 = vmatpush1.msra.mxu1 %v128_v20  ;;  %v111_v33 = vld [vmem:[#allocation6 + $0xe8] sm:$0xff]  ;;  %v113_v34 = vld [vmem:[#allocation6 + $0xf8] sm:$0xff]  ;;  %v110_v35 = vld [vmem:[#allocation6 + $0xe0] sm:$0xff] }
  0x40   :  { %178 = vmatprep.subr.mxu0 %v123_v21  ;;  %255 = vmatprep.subr.mxu1 %v125_v22  ;;  %v112_v36 = vld [vmem:[#allocation6 + $0xf0] sm:$0xff]  ;;  %v107_v37 = vld [vmem:[#allocation6 + $0xc8] sm:$0xff]  ;;  %v109_v38 = vld [vmem:[#allocation6 + $0xd8] sm:$0xff] }
  0x41   :  { %179 = vmatpush1.msra.mxu0 %v122_v23  ;;  %256 = vmatpush1.msra.mxu1 %v124_v24  ;;  %v106_v39 = vld [vmem:[#allocation6 + $0xc0] sm:$0xff]  ;;  %v108_v40 = vld [vmem:[#allocation6 + $0xd0] sm:$0xff]  ;;  %v103_v41 = vld [vmem:[#allocation6 + $0xa8] sm:$0xff] }
  0x42   :  { %180 = vmatprep.subr.mxu0 %v119_v25  ;;  %257 = vmatprep.subr.mxu1 %v121_v26  ;;  %v105_v42 = vld [vmem:[#allocation6 + $0xb8] sm:$0xff]  ;;  %v102_v43 = vld [vmem:[#allocation6 + $0xa0] sm:$0xff]  ;;  %v104_v44 = vld [vmem:[#allocation6 + $0xb0] sm:$0xff] }
  0x43   :  { %181 = vmatpush1.msra.mxu0 %v118_v27  ;;  %258 = vmatpush1.msra.mxu1 %v120_v28  ;;  %v99_v45 = vld [vmem:[#allocation6 + $0x88] sm:$0xff]  ;;  %v101_v46 = vld [vmem:[#allocation6 + $0x98] sm:$0xff]  ;;  %v98_v47 = vld [vmem:[#allocation6 + $0x80] sm:$0xff] }
  0x44   :  { %182 = vmatprep.subr.mxu0 %v115_v29  ;;  %259 = vmatprep.subr.mxu1 %v117_v30  ;;  %v100_v48 = vld [vmem:[#allocation6 + $0x90] sm:$0xff]  ;;  %v95_v49 = vld [vmem:[#allocation6 + $0x68] sm:$0xff]  ;;  %v97_v50 = vld [vmem:[#allocation6 + $0x78] sm:$0xff] }
  0x45   :  { %183 = vmatpush1.msra.mxu0 %v114_v31  ;;  %260 = vmatpush1.msra.mxu1 %v116_v32  ;;  %v94_v51 = vld [vmem:[#allocation6 + $0x60] sm:$0xff]  ;;  %v96_v52 = vld [vmem:[#allocation6 + $0x70] sm:$0xff]  ;;  %v91_v53 = vld [vmem:[#allocation6 + $0x48] sm:$0xff] }
  0x46   :  { %184 = vmatprep.subr.mxu0 %v111_v33  ;;  %261 = vmatprep.subr.mxu1 %v113_v34  ;;  %v93_v54 = vld [vmem:[#allocation6 + $0x58] sm:$0xff]  ;;  %v90_v55 = vld [vmem:[#allocation6 + $0x40] sm:$0xff]  ;;  %v92_v56 = vld [vmem:[#allocation6 + $0x50] sm:$0xff] }
  0x47   :  { %185 = vmatpush1.msra.mxu0 %v110_v35  ;;  %262 = vmatpush1.msra.mxu1 %v112_v36  ;;  %v87_v57 = vld [vmem:[#allocation6 + $0x28] sm:$0xff]  ;;  %v89_v58 = vld [vmem:[#allocation6 + $0x38] sm:$0xff]  ;;  %v86_v59 = vld [vmem:[#allocation6 + $0x20] sm:$0xff] }
  0x48   :  { %186 = vmatprep.subr.mxu0 %v107_v37  ;;  %263 = vmatprep.subr.mxu1 %v109_v38  ;;  %v88_v60 = vld [vmem:[#allocation6 + $0x30] sm:$0xff]  ;;  %v83_v61 = vld [vmem:[#allocation6 + $0x8] sm:$0xff]  ;;  %v85_v62 = vld [vmem:[#allocation6 + $0x18] sm:$0xff] }
  0x49   :  { %187 = vmatpush1.msra.mxu0 %v106_v39  ;;  %264 = vmatpush1.msra.mxu1 %v108_v40  ;;  %v82_v63 = vld [vmem:[#allocation6] sm:$0xff]  ;;  %v84_v1 = vld [vmem:[#allocation6 + $0x10] sm:$0xff]  ;;  %v81_v7 = vld [vmem:[#allocation3 + $0x8] sm:$0xff] }
  0x4a   :  { %188 = vmatprep.subr.mxu0 %v103_v41  ;;  %265 = vmatprep.subr.mxu1 %v105_v42  ;;  %v80_v2 = vld [vmem:[#allocation3] sm:$0xff]  ;;  %v395_v3 = vld [vmem:[#allocation9 + $0xf8] sm:$0xff]  ;;  %v424_v16 = vld [vmem:[#allocation9 + $0x1e0] sm:$0xff] }
  0x4b   :  { %189 = vmatpush1.msra.mxu0 %v102_v43  ;;  %266 = vmatpush1.msra.mxu1 %v104_v44  ;;  %v427_v4 = vld [vmem:[#allocation9 + $0x1f8] sm:$0xff]  ;;  %v394_v8 = vld [vmem:[#allocation9 + $0xf0] sm:$0xff]  ;;  %v393_v12 = vld [vmem:[#allocation9 + $0xe8] sm:$0xff] }
  0x4c   :  { %190 = vmatprep.subr.mxu0 %v99_v45  ;;  %267 = vmatprep.subr.mxu1 %v101_v46  ;;  %v379_v5 = vld [vmem:[#allocation9 + $0x78] sm:$0xff]  ;;  %v426_v9 = vld [vmem:[#allocation9 + $0x1f0] sm:$0xff]  ;;  %v425_v13 = vld [vmem:[#allocation9 + $0x1e8] sm:$0xff] }
  0x4d   :  { %191 = vmatpush1.msra.mxu0 %v98_v47  ;;  %268 = vmatpush1.msra.mxu1 %v100_v48  ;;  %v411_v6 = vld [vmem:[#allocation9 + $0x178] sm:$0xff]  ;;  %v378_v10 = vld [vmem:[#allocation9 + $0x70] sm:$0xff]  ;;  %v377_v14 = vld [vmem:[#allocation9 + $0x68] sm:$0xff] }
  0x4e   :  { %192 = vmatprep.subr.mxu0 %v95_v49  ;;  %269 = vmatprep.subr.mxu1 %v97_v50  ;;  %v410_v11 = vld [vmem:[#allocation9 + $0x170] sm:$0xff]  ;;  %v409_v15 = vld [vmem:[#allocation9 + $0x168] sm:$0xff]  ;;  %v376_v17 = vld [vmem:[#allocation9 + $0x60] sm:$0xff] }
  0x4f   :  { %193 = vmatpush1.msra.mxu0 %v94_v51  ;;  %270 = vmatpush1.msra.mxu1 %v96_v52  ;;  %v408_v18 = vld [vmem:[#allocation9 + $0x160] sm:$0xff]  ;;  %v391_v19 = vld [vmem:[#allocation9 + $0xd8] sm:$0xff]  ;;  %v390_v23 = vld [vmem:[#allocation9 + $0xd0] sm:$0xff] }
  0x50   :  { %194 = vmatprep.subr.mxu0 %v91_v53  ;;  %271 = vmatprep.subr.mxu1 %v93_v54  ;;  %v423_v20 = vld [vmem:[#allocation9 + $0x1d8] sm:$0xff]  ;;  %v422_v24 = vld [vmem:[#allocation9 + $0x1d0] sm:$0xff]  ;;  %v389_v27 = vld [vmem:[#allocation9 + $0xc8] sm:$0xff] }
  0x51   :  { %195 = vmatpush1.msra.mxu0 %v90_v55  ;;  %272 = vmatpush1.msra.mxu1 %v92_v56  ;;  %v375_v21 = vld [vmem:[#allocation9 + $0x58] sm:$0xff]  ;;  %v374_v25 = vld [vmem:[#allocation9 + $0x50] sm:$0xff]  ;;  %v421_v28 = vld [vmem:[#allocation9 + $0x1c8] sm:$0xff] }
  0x52   :  { %196 = vmatprep.subr.mxu0 %v87_v57  ;;  %273 = vmatprep.subr.mxu1 %v89_v58  ;;  %v407_v22 = vld [vmem:[#allocation9 + $0x158] sm:$0xff]  ;;  %v406_v26 = vld [vmem:[#allocation9 + $0x150] sm:$0xff]  ;;  %v373_v29 = vld [vmem:[#allocation9 + $0x48] sm:$0xff] }
  0x53   :  { %197 = vmatpush1.msra.mxu0 %v86_v59  ;;  %274 = vmatpush1.msra.mxu1 %v88_v60  ;;  %v405_v30 = vld [vmem:[#allocation9 + $0x148] sm:$0xff]  ;;  %v388_v31 = vld [vmem:[#allocation9 + $0xc0] sm:$0xff]  ;;  %v387_v35 = vld [vmem:[#allocation9 + $0xb8] sm:$0xff] }
  0x54   :  { %198 = vmatprep.subr.mxu0 %v83_v61  ;;  %275 = vmatprep.subr.mxu1 %v85_v62  ;;  %v420_v32 = vld [vmem:[#allocation9 + $0x1c0] sm:$0xff]  ;;  %v419_v36 = vld [vmem:[#allocation9 + $0x1b8] sm:$0xff]  ;;  %v386_v39 = vld [vmem:[#allocation9 + $0xb0] sm:$0xff] }
  0x55   :  { %199 = vmatpush1.msra.mxu0 %v82_v63  ;;  %276 = vmatpush1.msra.mxu1 %v84_v1  ;;  %v372_v33 = vld [vmem:[#allocation9 + $0x40] sm:$0xff]  ;;  %v371_v37 = vld [vmem:[#allocation9 + $0x38] sm:$0xff]  ;;  %v418_v40 = vld [vmem:[#allocation9 + $0x1b0] sm:$0xff] }
  0x56   :  { %233 = vmatmul.mubr.f32.vlgmr.msra.gmra.mxu0 %v80_v2  ;;  %310 = vmatmul.mubr.f32.vlgmr.msra.gmra.mxu1 %v80_v2  ;;  %v404_v34 = vld [vmem:[#allocation9 + $0x140] sm:$0xff]  ;;  %v403_v38 = vld [vmem:[#allocation9 + $0x138] sm:$0xff]  ;;  %v370_v41 = vld [vmem:[#allocation9 + $0x30] sm:$0xff] }
  0x57   :  { %238 = vmatprep.mubr.f32.mxu0 %v836_v0  ;;  %315 = vmatprep.mubr.f32.mxu1 %v836_v0  ;;  %v392_v0 = vld [vmem:[#allocation9 + $0xe0] sm:$0xff]  ;;  %v402_v42 = vld [vmem:[#allocation9 + $0x130] sm:$0xff]  ;;  %v385_v43 = vld [vmem:[#allocation9 + $0xa8] sm:$0xff] }
  0x58   :  { %618 = vmatprep.subr.mxu0 %v395_v3  ;;  %656 = vmatprep.subr.mxu1 %v427_v4  ;;  %v417_v44 = vld [vmem:[#allocation9 + $0x1a8] sm:$0xff]  ;;  %v384_v47 = vld [vmem:[#allocation9 + $0xa0] sm:$0xff]  ;;  %v383_v51 = vld [vmem:[#allocation9 + $0x98] sm:$0xff]  ;;  %v148_v4 = vlaneseq }
  0x59   :  { %619 = vmatpush3.msra.mxu0 %v379_v5  ;;  %657 = vmatpush3.msra.mxu1 %v411_v6  ;;  %v369_v45 = vld [vmem:[#allocation9 + $0x28] sm:$0xff]  ;;  %v416_v48 = vld [vmem:[#allocation9 + $0x1a0] sm:$0xff]  ;;  %v415_v52 = vld [vmem:[#allocation9 + $0x198] sm:$0xff] }
  0x5a   :  { %239 = vmatmul.mubr.f32.gmra.mxu0 %v81_v7  ;;  %316 = vmatmul.mubr.f32.gmra.mxu1 %v81_v7  ;;  %v401_v46 = vld [vmem:[#allocation9 + $0x128] sm:$0xff]  ;;  %v368_v49 = vld [vmem:[#allocation9 + $0x20] sm:$0xff]  ;;  %v367_v53 = vld [vmem:[#allocation9 + $0x18] sm:$0xff]  ;;  %v149_v5 = vshrl.u32 %v148_v4, 7 }
  0x5b   :  { %620 = vmatprep.subr.mxu0 %v394_v8  ;;  %658 = vmatprep.subr.mxu1 %v426_v9  ;;  %v400_v50 = vld [vmem:[#allocation9 + $0x120] sm:$0xff]  ;;  %v399_v54 = vld [vmem:[#allocation9 + $0x118] sm:$0xff]  ;;  %v382_v55 = vld [vmem:[#allocation9 + $0x90] sm:$0xff] }
  0x5c   :  { %621 = vmatpush3.msra.mxu0 %v378_v10  ;;  %659 = vmatpush3.msra.mxu1 %v410_v11  ;;  %v414_v56 = vld [vmem:[#allocation9 + $0x190] sm:$0xff]  ;;  %v381_v59 = vld [vmem:[#allocation9 + $0x88] sm:$0xff]  ;;  %v380_v63 = vld [vmem:[#allocation9 + $0x80] sm:$0xff]  ;;  %v150_v6 = vsub.s32 0, %v149_v5  ;;  %v158_v7 = vsub.s32 2, %v149_v5  ;;  %v154_v9 = vsub.s32 1, %v149_v5 }
  0x5d   :  { %622 = vmatprep.subr.mxu0 %v393_v12  ;;  %660 = vmatprep.subr.mxu1 %v425_v13  ;;  %v366_v57 = vld [vmem:[#allocation9 + $0x10] sm:$0xff]  ;;  %v413_v60 = vld [vmem:[#allocation9 + $0x188] sm:$0xff]  ;;  %v412_v1 = vld [vmem:[#allocation9 + $0x180] sm:$0xff]  ;;  %v162_v10 = vsub.s32 3, %v149_v5 }
  0x5e   :  { %623 = vmatpush3.msra.mxu0 %v377_v14  ;;  %661 = vmatpush3.msra.mxu1 %v409_v15  ;;  %v398_v58 = vld [vmem:[#allocation9 + $0x110] sm:$0xff]  ;;  %v365_v61 = vld [vmem:[#allocation9 + $0x8] sm:$0xff]  ;;  %v364_v2 = vld [vmem:[#allocation9] sm:$0xff] }
  0x5f   :  { %624 = vmatprep.subr.mxu0 %v392_v0  ;;  %662 = vmatprep.subr.mxu1 %v424_v16  ;;  %v397_v62 = vld [vmem:[#allocation9 + $0x108] sm:$0xff]  ;;  %v396_v3 = vld [vmem:[#allocation9 + $0x100] sm:$0xff]  ;;  %v146_v8 = vld [vmem:[#allocation8] sm:$0xf] }
  0x60   :  { %625 = vmatpush3.msra.mxu0 %v376_v17  ;;  %663 = vmatpush3.msra.mxu1 %v408_v18  ;;  %v151_v11 = vrot.slane %v146_v8, %v150_v6  ;;  %v159_v12 = vrot.slane %v146_v8, %v158_v7  ;;  %v155_v15 = vrot.slane %v146_v8, %v154_v9 }
  0x61   :  { %626 = vmatprep.subr.mxu0 %v391_v19  ;;  %664 = vmatprep.subr.mxu1 %v423_v20  ;;  %v163_v0 = vrot.slane %v146_v8, %v162_v10 }
  0x62   :  { %627 = vmatpush3.msra.mxu0 %v375_v21  ;;  %665 = vmatpush3.msra.mxu1 %v407_v22 }
  0x63   :  { %628 = vmatprep.subr.mxu0 %v390_v23  ;;  %666 = vmatprep.subr.mxu1 %v422_v24 }
  0x64   :  { %629 = vmatpush3.msra.mxu0 %v374_v25  ;;  %667 = vmatpush3.msra.mxu1 %v406_v26 }
  0x65   :  { %630 = vmatprep.subr.mxu0 %v389_v27  ;;  %668 = vmatprep.subr.mxu1 %v421_v28 }
  0x66   :  { %631 = vmatpush3.msra.mxu0 %v373_v29  ;;  %669 = vmatpush3.msra.mxu1 %v405_v30 }
  0x67   :  { %632 = vmatprep.subr.mxu0 %v388_v31  ;;  %670 = vmatprep.subr.mxu1 %v420_v32 }
  0x68   :  { %633 = vmatpush3.msra.mxu0 %v372_v33  ;;  %671 = vmatpush3.msra.mxu1 %v404_v34 }
  0x69   :  { %634 = vmatprep.subr.mxu0 %v387_v35  ;;  %672 = vmatprep.subr.mxu1 %v419_v36 }
  0x6a   :  { %635 = vmatpush3.msra.mxu0 %v371_v37  ;;  %673 = vmatpush3.msra.mxu1 %v403_v38 }
  0x6b   :  { %636 = vmatprep.subr.mxu0 %v386_v39  ;;  %674 = vmatprep.subr.mxu1 %v418_v40 }
  0x6c   :  { %637 = vmatpush3.msra.mxu0 %v370_v41  ;;  %675 = vmatpush3.msra.mxu1 %v402_v42 }
  0x6d   :  { %638 = vmatprep.subr.mxu0 %v385_v43  ;;  %676 = vmatprep.subr.mxu1 %v417_v44 }
  0x6e   :  { %639 = vmatpush3.msra.mxu0 %v369_v45  ;;  %677 = vmatpush3.msra.mxu1 %v401_v46 }
  0x6f   :  { %640 = vmatprep.subr.mxu0 %v384_v47  ;;  %678 = vmatprep.subr.mxu1 %v416_v48 }
  0x70   :  { %641 = vmatpush3.msra.mxu0 %v368_v49  ;;  %679 = vmatpush3.msra.mxu1 %v400_v50 }
  0x71   :  { %642 = vmatprep.subr.mxu0 %v383_v51  ;;  %680 = vmatprep.subr.mxu1 %v415_v52 }
  0x72   :  { %643 = vmatpush3.msra.mxu0 %v367_v53  ;;  %681 = vmatpush3.msra.mxu1 %v399_v54 }
  0x73   :  { %644 = vmatprep.subr.mxu0 %v382_v55  ;;  %682 = vmatprep.subr.mxu1 %v414_v56 }
  0x74   :  { %645 = vmatpush3.msra.mxu0 %v366_v57  ;;  %683 = vmatpush3.msra.mxu1 %v398_v58 }
  0x75   :  { %646 = vmatprep.subr.mxu0 %v381_v59  ;;  %684 = vmatprep.subr.mxu1 %v413_v60 }
  0x76   :  { %647 = vmatpush3.msra.mxu0 %v365_v61  ;;  %685 = vmatpush3.msra.mxu1 %v397_v62 }
  0x77   :  { %648 = vmatprep.subr.mxu0 %v380_v63  ;;  %686 = vmatprep.subr.mxu1 %v412_v1 }
  0x78   :  { %649 = vmatpush3.msra.mxu0 %v364_v2  ;;  %687 = vmatpush3.msra.mxu1 %v396_v3 }
 0x116   :  { %v234_v13 = vpop.f32.mrf.mxu0  ;;  %v311_v14 = vpop.f32.mrf.mxu1 }
 0x117   :  { %v235_v16 = vadd.f32 %v234_v13, %v151_v11  ;;  %v312_v17 = vadd.f32 %v311_v14, %v159_v12  ;;  %v617_v14 = vld [vmem:[%s903_s4] ss:$0 sm:$0xff] }
 0x118   :  { %v236_v18 = vpop.f32.mrf.mxu0  ;;  %v313_v19 = vpop.f32.mrf.mxu1 }
 0x119   :  { %v330_v20 = vmul.f32 0.70710677, %v235_v16  ;;  %v332_v21 = vmul.f32 0.70710677, %v312_v17  ;;  %v237_v22 = vadd.f32 %v236_v18, %v155_v15  ;;  %v314_v23 = vadd.f32 %v313_v19, %v163_v0 }
 0x11a   :  { %v240_v24 = vpop.f32.mrf.mxu0  ;;  %v317_v25 = vpop.f32.mrf.mxu1  ;;  %v322_v47 = vmul.f32 0.5, %v235_v16  ;;  %v324_v51 = vmul.f32 0.5, %v312_v17 }
 0x11b   :  { %704 = verf.f32 %v330_v20  ;;  %v241_v26 = vadd.f32 %v240_v24, %v151_v11  ;;  %v318_v27 = vadd.f32 %v317_v25, %v159_v12  ;;  %v331_v28 = vmul.f32 0.70710677, %v237_v22 }
 0x11c   :  { %706 = verf.f32 %v332_v21  ;;  %v242_v29 = vpop.f32.mrf.mxu0  ;;  %v319_v30 = vpop.f32.mrf.mxu1  ;;  %v333_v31 = vmul.f32 0.70710677, %v314_v23  ;;  %v323_v44 = vmul.f32 0.5, %v237_v22  ;;  %v325_v48 = vmul.f32 0.5, %v314_v23 }
 0x11d   :  { %v334_v32 = vmul.f32 0.70710677, %v241_v26  ;;  %708 = verf.f32 %v331_v28  ;;  %v336_v33 = vmul.f32 0.70710677, %v318_v27  ;;  %v243_v34 = vadd.f32 %v242_v29, %v155_v15 }
 0x11e   :  { %v320_v35 = vadd.f32 %v319_v30, %v163_v0  ;;  %710 = verf.f32 %v333_v31  ;;  %v326_v62 = vmul.f32 0.5, %v241_v26  ;;  %v328_v2 = vmul.f32 0.5, %v318_v27 }
 0x11f   :  { %712 = verf.f32 %v334_v32  ;;  %v335_v36 = vmul.f32 0.70710677, %v243_v34  ;;  %v327_v59 = vmul.f32 0.5, %v243_v34 }
 0x120   :  { %714 = verf.f32 %v336_v33  ;;  %v337_v37 = vmul.f32 0.70710677, %v320_v35  ;;  %v329_v63 = vmul.f32 0.5, %v320_v35 }
 0x121   :  { %716 = verf.f32 %v335_v36 }
 0x122   :  { %718 = verf.f32 %v337_v37 }
 0x128   :  { %v705_v38 = vpop.eup %704 }
 0x129   :  { %v707_v39 = vpop.eup %706  ;;  %v346_v41 = vadd.f32 1.0, %v705_v38 }
 0x12a   :  { %v709_v40 = vpop.eup %708  ;;  %v348_v43 = vadd.f32 1.0, %v707_v39 }
 0x12b   :  { %v711_v42 = vpop.eup %710  ;;  %v347_v45 = vadd.f32 1.0, %v709_v40  ;;  %v354_v54 = vmul.f32 %v346_v41, %v322_v47 }
 0x12c   :  { %v713_v46 = vpop.eup %712  ;;  %v349_v49 = vadd.f32 1.0, %v711_v42  ;;  %v356_v58 = vmul.f32 %v348_v43, %v324_v51 }
 0x12d   :  { %v715_v50 = vpop.eup %714  ;;  %v355_v52 = vmul.f32 %v347_v45, %v323_v44  ;;  %v350_v56 = vadd.f32 1.0, %v713_v46 }
 0x12e   :  { %v717_v53 = vpop.eup %716  ;;  %v357_v55 = vmul.f32 %v349_v49, %v325_v48  ;;  %v352_v61 = vadd.f32 1.0, %v715_v50 }
 0x12f   :  { %v719_v57 = vpop.eup %718  ;;  %492 = vmatprep.mubr.f32.mxu0 %v355_v52  ;;  %v351_v60 = vadd.f32 1.0, %v717_v53  ;;  %v358_v5 = vmul.f32 %v350_v56, %v326_v62 }
 0x130   :  { %567 = vmatprep.mubr.f32.mxu1 %v357_v55  ;;  %493 = vmatmul.mubr.f32.vlgmr.msra.gmra.mxu0 %v354_v54  ;;  %v353_v1 = vadd.f32 1.0, %v719_v57  ;;  %v360_v6 = vmul.f32 %v352_v61, %v328_v2 }
 0x131   :  { %568 = vmatmul.mubr.f32.vlgmr.msra.gmra.mxu1 %v356_v58  ;;  %v359_v3 = vmul.f32 %v351_v60, %v327_v59 }
 0x132   :  { %v361_v4 = vmul.f32 %v353_v1, %v329_v63 }
 0x133   :  { %497 = vmatprep.mubr.f32.mxu0 %v359_v3 }
 0x134   :  { %572 = vmatprep.mubr.f32.mxu1 %v361_v4  ;;  %498 = vmatmul.mubr.f32.gmra.mxu0 %v358_v5 }
 0x135   :  { %573 = vmatmul.mubr.f32.gmra.mxu1 %v360_v6 }
 0x1f0   :  { %v650_v7 = vpop.f32.mrf.mxu0 }
 0x1f1   :  { %v688_v8 = vpop.f32.mrf.mxu1 }
 0x1f2   :  { %v651_v9 = vpop.f32.mrf.mxu0 }
 0x1f3   :  { %v652_v10 = vadd.f32 %v651_v9, %v650_v7  ;;  %v689_v11 = vpop.f32.mrf.mxu1 }
 0x1f4   :  { %v690_v12 = vadd.f32 %v689_v11, %v688_v8  ;;  %v653_v13 = vpop.f32.mrf.mxu0 }
 0x1f5   :  { %v691_v15 = vpop.f32.mrf.mxu1 }
 0x1f6   :  { %v570_v0 = vadd.f32 %v690_v12, %v652_v10  ;;  %v654_v16 = vpop.f32.mrf.mxu0 }
 0x1f7   :  { %v655_v17 = vadd.f32 %v654_v16, %v653_v13  ;;  %v692_v18 = vpop.f32.mrf.mxu1 }
 0x1f8   :  { %v594_v19 = vadd.f32 %v617_v14, %v570_v0  ;;  %v693_v20 = vadd.f32 %v692_v18, %v691_v15 }
 0x1fa   :  { %596 = vst [vmem:[#allocation11] sm:$0xff] %v594_v19  ;;  %v575_v21 = vadd.f32 %v693_v20, %v655_v17 }
 0x1fc   :  { %v595_v22 = vadd.f32 %v617_v14, %v575_v21 }
 0x1fe   :  { %597 = vst [vmem:[#allocation11 + $0x8] sm:$0xff] %v595_v22 }
 0x1ff   :  { %811 = shalt.err (!%p808_p10)
}
 0x200   :  { %609 = dma.vmem_to_hbm [thread:$0]  %s604_s16, 256, %s904_s5, [#allocation5], %s832_s28, %s832_s28, %s833_s29  }
 0x201   :  { %826 = dma.done.wait [#allocation5], 256  }
 0x202   :  { %827 = vsyncadd [#allocation5], 4294967040 }
 0x203   :  { %613 = vsyncpa [#allocation4], 1 }
 0x204   :  { %614 = vsyncpa [#allocation7], 1 }
 0x205   :  { %615 = vsyncpa [#allocation10], 1 }
 0x206   :  { %616 = vsyncpa [#allocation5], 1 }

</bundles_post_ra>
